<compile_context>
chip_gen: v7x
topology: tpu7x:2x2x1
jax: 0.10.0
libtpu: 0.0.40
codegen_flags: <defaults>
</compile_context>

<pallas_src>
import functools

import jax
import jax.numpy as jnp
from jax.experimental import pallas as pl
from jax.experimental.pallas import tpu as pltpu


def _round_up(x, m):
    return ((x + m - 1) // m) * m


def _lstm_fc_kernel(T, B, H, x_ref, w_ih_ref, w_hh_ref, b_ref, w_fc_ref,
                    b_fc_ref, out_ref, xw_ref):
    """Whole forward pass in one (gridless) kernel invocation.

    T, B, H    : static python ints (timesteps, padded batch, hidden size)
    x_ref      : (T*B, I)   bf16   time-major, batch-padded input, flattened
    w_ih_ref   : (I, G)     bf16   input->gates, packed [i|f|g|o], G=rnd128(4H)
    w_hh_ref   : (H, G)     bf16   hidden->gates, packed
    b_ref      : (1, G)     f32    b_ih + b_hh, packed
    w_fc_ref   : (H, Cp)    bf16   fc_1 weight (transposed, lane-padded)
    b_fc_ref   : (1, Cp)    f32    fc_1 bias (lane-padded)
    out_ref    : (B, Cp)    f32    logits (lane-dense, padded)
    xw_ref     : (T*B, G)   f32    VMEM scratch for the hoisted x@W_ih + b
    """
    w_hh = w_hh_ref[...]                               # (H, G) bf16, resident

    # Input contribution for ALL timesteps in one MXU push; bias folded once.
    xw_ref[...] = jnp.dot(x_ref[...], w_ih_ref[...],
                          preferred_element_type=jnp.float32) + b_ref[...]

    h = jnp.zeros((B, H), jnp.float32)
    c = jnp.zeros((B, H), jnp.float32)

    # T is small and static -> fully unrolled straight-line recurrence.
    for t in range(T):
        gates = xw_ref[pl.ds(t * B, B), :] + jnp.dot(
            h.astype(w_hh.dtype), w_hh,
            preferred_element_type=jnp.float32)        # (B, G) f32

        # One sigmoid + one tanh over the full packed gate block (2 EUP pushes),
        # then cheap static lane slices to pick out i/f/g/o.
        sig = jax.nn.sigmoid(gates)
        th = jnp.tanh(gates)
        i_g = sig[:, 0 * H:1 * H]
        f_g = sig[:, 1 * H:2 * H]
        g_g = th[:, 2 * H:3 * H]
        o_g = sig[:, 3 * H:4 * H]

        c = f_g * c + i_g * g_g
        h = o_g * jnp.tanh(c)                          # 3rd EUP push

    # out = relu(h_n) @ W_fc^T + b_fc   (dropout == identity in eval mode)
    relu_h = jnp.maximum(h, 0.0)
    out_ref[...] = jnp.dot(relu_h.astype(w_fc_ref.dtype), w_fc_ref[...],
                           preferred_element_type=jnp.float32) + b_fc_ref[...]


@jax.jit
def network_forward(x_btI, w_ih, w_hh, b_ih, b_hh, w_fc, b_fc):
    """x_btI: (B, T, I) batch-first input (PyTorch convention).

    w_ih: (4H, I), w_hh: (4H, H), b_ih/b_hh: (4H,)   -- PyTorch LSTM layout
    w_fc: (C, H),  b_fc: (C,)                        -- PyTorch Linear layout
    returns logits (B, C), float32
    """
    B, T, I = x_btI.shape
    H = w_hh.shape[1]
    C = w_fc.shape[0]

    LANE, SUBLANE = 128, 8
    G = _round_up(4 * H, LANE)      # packed gate block [i|f|g|o], zero pad tail
    Cp = _round_up(C, LANE)         # lane-dense output store
    Bp = _round_up(B, SUBLANE)      # sublane-aligned batch

    # ---- wrapper glue: transpose / pad / cast (pure layout plumbing) --------
    x_tbI = jnp.transpose(x_btI, (1, 0, 2)).astype(jnp.float32)      # (T, B, I)
    x_tbI = jnp.pad(x_tbI, ((0, 0), (0, Bp - B), (0, 0)))            # (T, Bp, I)
    x_flat = x_tbI.reshape(T * Bp, I).astype(jnp.bfloat16)           # (T*Bp, I)

    gp = G - 4 * H                  # trailing zero-pad of the packed gate axis
    w_ih_t = jnp.pad(jnp.transpose(w_ih).astype(jnp.float32),
                     ((0, 0), (0, gp))).astype(jnp.bfloat16)          # (I, G)
    w_hh_t = jnp.pad(jnp.transpose(w_hh).astype(jnp.float32),
                     ((0, 0), (0, gp))).astype(jnp.bfloat16)          # (H, G)
    b_comb = jnp.pad((b_ih + b_hh).astype(jnp.float32).reshape(1, 4 * H),
                     ((0, 0), (0, gp)))                               # (1, G)
    w_fc_t = jnp.pad(jnp.transpose(w_fc).astype(jnp.float32),
                     ((0, 0), (0, Cp - C))).astype(jnp.bfloat16)      # (H, Cp)
    b_fc_r = jnp.pad(b_fc.astype(jnp.float32).reshape(1, C),
                     ((0, 0), (0, Cp - C)))                           # (1, Cp)

    # ---- advisory cost + VMEM budget (single-slab design) -------------------
    flops = 2 * T * Bp * I * G + 2 * T * Bp * H * G + 2 * Bp * H * Cp
    transcendentals = T * Bp * (2 * G + H)
    bytes_in = ((x_flat.size + w_ih_t.size + w_hh_t.size + w_fc_t.size) * 2
                + (b_comb.size + b_fc_r.size) * 4)
    bytes_out = Bp * Cp * 4
    cost = pl.CostEstimate(flops=int(flops),
                           transcendentals=int(transcendentals),
                           bytes_accessed=int(bytes_in + bytes_out))

    vmem_resident = bytes_in + bytes_out + T * Bp * G * 4   # + xw scratch
    # Everything (inputs + output + xw slab) is resident at once; keep well
    # under v7x's 32 MiB scoped default. Re-tile (chunk T) if this ever trips.
    assert vmem_resident < 16 * 1024 * 1024, (
        "single-invocation LSTM kernel no longer fits comfortably in VMEM; "
        "split the xw precompute / recurrence over T-chunks")

    kernel = functools.partial(_lstm_fc_kernel, T, Bp, H)

    out_pad = pl.pallas_call(
        kernel,
        out_shape=jax.ShapeDtypeStruct((Bp, Cp), jnp.float32),
        in_specs=[pl.BlockSpec(memory_space=pltpu.MemorySpace.VMEM)] * 6,
        out_specs=pl.BlockSpec(memory_space=pltpu.MemorySpace.VMEM),
        scratch_shapes=[pltpu.VMEM((T * Bp, G), jnp.float32)],
        cost_estimate=cost,
    )(x_flat, w_ih_t, w_hh_t, b_comb, w_fc_t, b_fc_r)

    return out_pad[:B, :C]


def _reference_forward(x_btI, w_ih, w_hh, b_ih, b_hh, w_fc, b_fc):
    """Pure-JAX f32 reference (same math as the PyTorch module, eval mode)."""
    B, T, I = x_btI.shape
    H = w_hh.shape[1]
    h = jnp.zeros((B, H), jnp.float32)
    c = jnp.zeros((B, H), jnp.float32)
    for t in range(T):
        x_t = x_btI[:, t, :]
        gates = x_t @ w_ih.T + b_ih + h @ w_hh.T + b_hh
        i_g = jax.nn.sigmoid(gates[:, 0 * H:1 * H])
        f_g = jax.nn.sigmoid(gates[:, 1 * H:2 * H])
        g_g = jnp.tanh(gates[:, 2 * H:3 * H])
        o_g = jax.nn.sigmoid(gates[:, 3 * H:4 * H])
        c = f_g * c + i_g * g_g
        h = o_g * jnp.tanh(c)
    return jnp.maximum(h, 0.0) @ w_fc.T + b_fc


if __name__ == "__main__":
    # Small shapes consistent with the module:
    #   input_size=16, seq_len=8, num_classes=4, hidden_layer_size=32, batch=2
    B, T, I, H, C = 2, 8, 16, 32, 4

    key = jax.random.PRNGKey(0)
    kx, k1, k2, k3, k4, k5, k6 = jax.random.split(key, 7)

    x = jax.random.normal(kx, (B, T, I), dtype=jnp.float32)

    # Deterministic synthetic parameters (PyTorch layouts).
    scale = 0.1
    w_ih = scale * jax.random.normal(k1, (4 * H, I), dtype=jnp.float32)
    w_hh = scale * jax.random.normal(k2, (4 * H, H), dtype=jnp.float32)
    b_ih = scale * jax.random.normal(k3, (4 * H,), dtype=jnp.float32)
    b_hh = scale * jax.random.normal(k4, (4 * H,), dtype=jnp.float32)
    w_fc = scale * jax.random.normal(k5, (C, H), dtype=jnp.float32)
    b_fc = scale * jax.random.normal(k6, (C,), dtype=jnp.float32)

    out = network_forward(x, w_ih, w_hh, b_ih, b_hh, w_fc, b_fc)
    out = jax.block_until_ready(out)

    ref = _reference_forward(x, w_ih, w_hh, b_ih, b_hh, w_fc, b_fc)
    assert out.shape == (B, C)
    # Matmul operands are bf16 (MXU-native) with f32 accumulation -> tolerance
    # reflects bf16 operand rounding vs the pure-f32 reference.
    assert jnp.allclose(out, ref, atol=2e-2, rtol=2e-2), "mismatch vs reference"

    print("KERNEL_OK")
</pallas_src>

<mosaic_0001>
module attributes {stable_mosaic.version = 11 : i64} {
  func.func @_lstm_fc_kernel(%arg0: memref<64x16xbf16, #tpu.memory_space<vmem>>, %arg1: memref<16x128xbf16, #tpu.memory_space<vmem>>, %arg2: memref<32x128xbf16, #tpu.memory_space<vmem>>, %arg3: memref<1x128xf32, #tpu.memory_space<vmem>>, %arg4: memref<32x128xbf16, #tpu.memory_space<vmem>>, %arg5: memref<1x128xf32, #tpu.memory_space<vmem>>, %arg6: memref<8x128xf32, #tpu.memory_space<vmem>>, %arg7: memref<64x128xf32, #tpu.memory_space<vmem>>) attributes {dimension_semantics = [], scalar_prefetch = 0 : i64, scratch_operands = 1 : i64, tpu.core_type = #tpu.core_type<tc>} {
    %c0 = arith.constant 0 : index
    %c0_0 = arith.constant 0 : index
    %0 = vector.load %arg2[%c0, %c0_0] : memref<32x128xbf16, #tpu.memory_space<vmem>>, vector<32x128xbf16>
    %c0_1 = arith.constant 0 : index
    %c0_2 = arith.constant 0 : index
    %1 = vector.load %arg0[%c0_1, %c0_2] : memref<64x16xbf16, #tpu.memory_space<vmem>>, vector<64x16xbf16>
    %c0_3 = arith.constant 0 : index
    %c0_4 = arith.constant 0 : index
    %2 = vector.load %arg1[%c0_3, %c0_4] : memref<16x128xbf16, #tpu.memory_space<vmem>>, vector<16x128xbf16>
    %cst = arith.constant dense<0.000000e+00> : vector<64x128xf32>
    %3 = tpu.matmul %1, %2, %cst {dimension_numbers = #tpu.dot_dimension_numbers<[1], [0], [0], [1], [0, 0, 1, 1], [], []>} : vector<64x16xbf16>, vector<16x128xbf16>, vector<64x128xf32> -> vector<64x128xf32>
    %c0_5 = arith.constant 0 : index
    %c0_6 = arith.constant 0 : index
    %4 = vector.load %arg3[%c0_5, %c0_6] : memref<1x128xf32, #tpu.memory_space<vmem>>, vector<1x128xf32>
    %5 = vector.broadcast %4 : vector<1x128xf32> to vector<64x128xf32>
    %6 = arith.addf %3, %5 : vector<64x128xf32>
    %c0_7 = arith.constant 0 : index
    %c0_8 = arith.constant 0 : index
    %7 = vector.load %arg7[%c0_7, %c0_8] : memref<64x128xf32, #tpu.memory_space<vmem>>, vector<64x128xf32>
    tpu.vector_store %arg7[%c0_7, %c0_8], %6 {strides = array<i32>} : memref<64x128xf32, #tpu.memory_space<vmem>>, vector<64x128xf32>,
    %cst_9 = arith.constant 0.000000e+00 : f32
    %8 = vector.broadcast %cst_9 : f32 to vector<8x32xf32>
    %cst_10 = arith.constant 0.000000e+00 : f32
    %9 = vector.broadcast %cst_10 : f32 to vector<8x32xf32>
    %c0_11 = arith.constant 0 : index
    %c0_12 = arith.constant 0 : index
    %10 = vector.load %arg7[%c0_11, %c0_12] : memref<64x128xf32, #tpu.memory_space<vmem>>, vector<8x128xf32>
    %11 = arith.truncf %8 : vector<8x32xf32> to vector<8x32xbf16>
    %cst_13 = arith.constant dense<0.000000e+00> : vector<8x128xf32>
    %12 = tpu.matmul %11, %0, %cst_13 {dimension_numbers = #tpu.dot_dimension_numbers<[1], [0], [0], [1], [0, 0, 1, 1], [], []>} : vector<8x32xbf16>, vector<32x128xbf16>, vector<8x128xf32> -> vector<8x128xf32>
    %13 = arith.addf %10, %12 : vector<8x128xf32>
    %14 = arith.negf %13 : vector<8x128xf32>
    %15 = math.exp %14 : vector<8x128xf32>
    %cst_14 = arith.constant 1.000000e+00 : f32
    %16 = vector.broadcast %cst_14 : f32 to vector<8x128xf32>
    %17 = arith.addf %16, %15 : vector<8x128xf32>
    %18 = arith.divf %16, %17 : vector<8x128xf32>
    %19 = math.tanh %13 : vector<8x128xf32>
    %20 = vector.extract_strided_slice %18 {offsets = [0, 0], sizes = [8, 32], strides = [1, 1]} : vector<8x128xf32> to vector<8x32xf32>
    %21 = vector.extract_strided_slice %18 {offsets = [0, 32], sizes = [8, 32], strides = [1, 1]} : vector<8x128xf32> to vector<8x32xf32>
    %22 = vector.extract_strided_slice %19 {offsets = [0, 64], sizes = [8, 32], strides = [1, 1]} : vector<8x128xf32> to vector<8x32xf32>
    %23 = vector.extract_strided_slice %18 {offsets = [0, 96], sizes = [8, 32], strides = [1, 1]} : vector<8x128xf32> to vector<8x32xf32>
    %24 = arith.mulf %21, %9 : vector<8x32xf32>
    %25 = arith.mulf %20, %22 : vector<8x32xf32>
    %26 = arith.addf %24, %25 : vector<8x32xf32>
    %27 = math.tanh %26 : vector<8x32xf32>
    %28 = arith.mulf %23, %27 : vector<8x32xf32>
    %c8 = arith.constant 8 : index
    %c0_15 = arith.constant 0 : index
    %29 = vector.load %arg7[%c8, %c0_15] : memref<64x128xf32, #tpu.memory_space<vmem>>, vector<8x128xf32>
    %30 = arith.truncf %28 : vector<8x32xf32> to vector<8x32xbf16>
    %cst_16 = arith.constant dense<0.000000e+00> : vector<8x128xf32>
    %31 = tpu.matmul %30, %0, %cst_16 {dimension_numbers = #tpu.dot_dimension_numbers<[1], [0], [0], [1], [0, 0, 1, 1], [], []>} : vector<8x32xbf16>, vector<32x128xbf16>, vector<8x128xf32> -> vector<8x128xf32>
    %32 = arith.addf %29, %31 : vector<8x128xf32>
    %33 = arith.negf %32 : vector<8x128xf32>
    %34 = math.exp %33 : vector<8x128xf32>
    %cst_17 = arith.constant 1.000000e+00 : f32
    %35 = vector.broadcast %cst_17 : f32 to vector<8x128xf32>
    %36 = arith.addf %35, %34 : vector<8x128xf32>
    %37 = arith.divf %35, %36 : vector<8x128xf32>
    %38 = math.tanh %32 : vector<8x128xf32>
    %39 = vector.extract_strided_slice %37 {offsets = [0, 0], sizes = [8, 32], strides = [1, 1]} : vector<8x128xf32> to vector<8x32xf32>
    %40 = vector.extract_strided_slice %37 {offsets = [0, 32], sizes = [8, 32], strides = [1, 1]} : vector<8x128xf32> to vector<8x32xf32>
    %41 = vector.extract_strided_slice %38 {offsets = [0, 64], sizes = [8, 32], strides = [1, 1]} : vector<8x128xf32> to vector<8x32xf32>
    %42 = vector.extract_strided_slice %37 {offsets = [0, 96], sizes = [8, 32], strides = [1, 1]} : vector<8x128xf32> to vector<8x32xf32>
    %43 = arith.mulf %40, %26 : vector<8x32xf32>
    %44 = arith.mulf %39, %41 : vector<8x32xf32>
    %45 = arith.addf %43, %44 : vector<8x32xf32>
    %46 = math.tanh %45 : vector<8x32xf32>
    %47 = arith.mulf %42, %46 : vector<8x32xf32>
    %c16 = arith.constant 16 : index
    %c0_18 = arith.constant 0 : index
    %48 = vector.load %arg7[%c16, %c0_18] : memref<64x128xf32, #tpu.memory_space<vmem>>, vector<8x128xf32>
    %49 = arith.truncf %47 : vector<8x32xf32> to vector<8x32xbf16>
    %cst_19 = arith.constant dense<0.000000e+00> : vector<8x128xf32>
    %50 = tpu.matmul %49, %0, %cst_19 {dimension_numbers = #tpu.dot_dimension_numbers<[1], [0], [0], [1], [0, 0, 1, 1], [], []>} : vector<8x32xbf16>, vector<32x128xbf16>, vector<8x128xf32> -> vector<8x128xf32>
    %51 = arith.addf %48, %50 : vector<8x128xf32>
    %52 = arith.negf %51 : vector<8x128xf32>
    %53 = math.exp %52 : vector<8x128xf32>
    %cst_20 = arith.constant 1.000000e+00 : f32
    %54 = vector.broadcast %cst_20 : f32 to vector<8x128xf32>
    %55 = arith.addf %54, %53 : vector<8x128xf32>
    %56 = arith.divf %54, %55 : vector<8x128xf32>
    %57 = math.tanh %51 : vector<8x128xf32>
    %58 = vector.extract_strided_slice %56 {offsets = [0, 0], sizes = [8, 32], strides = [1, 1]} : vector<8x128xf32> to vector<8x32xf32>
    %59 = vector.extract_strided_slice %56 {offsets = [0, 32], sizes = [8, 32], strides = [1, 1]} : vector<8x128xf32> to vector<8x32xf32>
    %60 = vector.extract_strided_slice %57 {offsets = [0, 64], sizes = [8, 32], strides = [1, 1]} : vector<8x128xf32> to vector<8x32xf32>
    %61 = vector.extract_strided_slice %56 {offsets = [0, 96], sizes = [8, 32], strides = [1, 1]} : vector<8x128xf32> to vector<8x32xf32>
    %62 = arith.mulf %59, %45 : vector<8x32xf32>
    %63 = arith.mulf %58, %60 : vector<8x32xf32>
    %64 = arith.addf %62, %63 : vector<8x32xf32>
    %65 = math.tanh %64 : vector<8x32xf32>
    %66 = arith.mulf %61, %65 : vector<8x32xf32>
    %c24 = arith.constant 24 : index
    %c0_21 = arith.constant 0 : index
    %67 = vector.load %arg7[%c24, %c0_21] : memref<64x128xf32, #tpu.memory_space<vmem>>, vector<8x128xf32>
    %68 = arith.truncf %66 : vector<8x32xf32> to vector<8x32xbf16>
    %cst_22 = arith.constant dense<0.000000e+00> : vector<8x128xf32>
    %69 = tpu.matmul %68, %0, %cst_22 {dimension_numbers = #tpu.dot_dimension_numbers<[1], [0], [0], [1], [0, 0, 1, 1], [], []>} : vector<8x32xbf16>, vector<32x128xbf16>, vector<8x128xf32> -> vector<8x128xf32>
    %70 = arith.addf %67, %69 : vector<8x128xf32>
    %71 = arith.negf %70 : vector<8x128xf32>
    %72 = math.exp %71 : vector<8x128xf32>
    %cst_23 = arith.constant 1.000000e+00 : f32
    %73 = vector.broadcast %cst_23 : f32 to vector<8x128xf32>
    %74 = arith.addf %73, %72 : vector<8x128xf32>
    %75 = arith.divf %73, %74 : vector<8x128xf32>
    %76 = math.tanh %70 : vector<8x128xf32>
    %77 = vector.extract_strided_slice %75 {offsets = [0, 0], sizes = [8, 32], strides = [1, 1]} : vector<8x128xf32> to vector<8x32xf32>
    %78 = vector.extract_strided_slice %75 {offsets = [0, 32], sizes = [8, 32], strides = [1, 1]} : vector<8x128xf32> to vector<8x32xf32>
    %79 = vector.extract_strided_slice %76 {offsets = [0, 64], sizes = [8, 32], strides = [1, 1]} : vector<8x128xf32> to vector<8x32xf32>
    %80 = vector.extract_strided_slice %75 {offsets = [0, 96], sizes = [8, 32], strides = [1, 1]} : vector<8x128xf32> to vector<8x32xf32>
    %81 = arith.mulf %78, %64 : vector<8x32xf32>
    %82 = arith.mulf %77, %79 : vector<8x32xf32>
    %83 = arith.addf %81, %82 : vector<8x32xf32>
    %84 = math.tanh %83 : vector<8x32xf32>
    %85 = arith.mulf %80, %84 : vector<8x32xf32>
    %c32 = arith.constant 32 : index
    %c0_24 = arith.constant 0 : index
    %86 = vector.load %arg7[%c32, %c0_24] : memref<64x128xf32, #tpu.memory_space<vmem>>, vector<8x128xf32>
    %87 = arith.truncf %85 : vector<8x32xf32> to vector<8x32xbf16>
    %cst_25 = arith.constant dense<0.000000e+00> : vector<8x128xf32>
    %88 = tpu.matmul %87, %0, %cst_25 {dimension_numbers = #tpu.dot_dimension_numbers<[1], [0], [0], [1], [0, 0, 1, 1], [], []>} : vector<8x32xbf16>, vector<32x128xbf16>, vector<8x128xf32> -> vector<8x128xf32>
    %89 = arith.addf %86, %88 : vector<8x128xf32>
    %90 = arith.negf %89 : vector<8x128xf32>
    %91 = math.exp %90 : vector<8x128xf32>
    %cst_26 = arith.constant 1.000000e+00 : f32
    %92 = vector.broadcast %cst_26 : f32 to vector<8x128xf32>
    %93 = arith.addf %92, %91 : vector<8x128xf32>
    %94 = arith.divf %92, %93 : vector<8x128xf32>
    %95 = math.tanh %89 : vector<8x128xf32>
    %96 = vector.extract_strided_slice %94 {offsets = [0, 0], sizes = [8, 32], strides = [1, 1]} : vector<8x128xf32> to vector<8x32xf32>
    %97 = vector.extract_strided_slice %94 {offsets = [0, 32], sizes = [8, 32], strides = [1, 1]} : vector<8x128xf32> to vector<8x32xf32>
    %98 = vector.extract_strided_slice %95 {offsets = [0, 64], sizes = [8, 32], strides = [1, 1]} : vector<8x128xf32> to vector<8x32xf32>
    %99 = vector.extract_strided_slice %94 {offsets = [0, 96], sizes = [8, 32], strides = [1, 1]} : vector<8x128xf32> to vector<8x32xf32>
    %100 = arith.mulf %97, %83 : vector<8x32xf32>
    %101 = arith.mulf %96, %98 : vector<8x32xf32>
    %102 = arith.addf %100, %101 : vector<8x32xf32>
    %103 = math.tanh %102 : vector<8x32xf32>
    %104 = arith.mulf %99, %103 : vector<8x32xf32>
    %c40 = arith.constant 40 : index
    %c0_27 = arith.constant 0 : index
    %105 = vector.load %arg7[%c40, %c0_27] : memref<64x128xf32, #tpu.memory_space<vmem>>, vector<8x128xf32>
    %106 = arith.truncf %104 : vector<8x32xf32> to vector<8x32xbf16>
    %cst_28 = arith.constant dense<0.000000e+00> : vector<8x128xf32>
    %107 = tpu.matmul %106, %0, %cst_28 {dimension_numbers = #tpu.dot_dimension_numbers<[1], [0], [0], [1], [0, 0, 1, 1], [], []>} : vector<8x32xbf16>, vector<32x128xbf16>, vector<8x128xf32> -> vector<8x128xf32>
    %108 = arith.addf %105, %107 : vector<8x128xf32>
    %109 = arith.negf %108 : vector<8x128xf32>
    %110 = math.exp %109 : vector<8x128xf32>
    %cst_29 = arith.constant 1.000000e+00 : f32
    %111 = vector.broadcast %cst_29 : f32 to vector<8x128xf32>
    %112 = arith.addf %111, %110 : vector<8x128xf32>
    %113 = arith.divf %111, %112 : vector<8x128xf32>
    %114 = math.tanh %108 : vector<8x128xf32>
    %115 = vector.extract_strided_slice %113 {offsets = [0, 0], sizes = [8, 32], strides = [1, 1]} : vector<8x128xf32> to vector<8x32xf32>
    %116 = vector.extract_strided_slice %113 {offsets = [0, 32], sizes = [8, 32], strides = [1, 1]} : vector<8x128xf32> to vector<8x32xf32>
    %117 = vector.extract_strided_slice %114 {offsets = [0, 64], sizes = [8, 32], strides = [1, 1]} : vector<8x128xf32> to vector<8x32xf32>
    %118 = vector.extract_strided_slice %113 {offsets = [0, 96], sizes = [8, 32], strides = [1, 1]} : vector<8x128xf32> to vector<8x32xf32>
    %119 = arith.mulf %116, %102 : vector<8x32xf32>
    %120 = arith.mulf %115, %117 : vector<8x32xf32>
    %121 = arith.addf %119, %120 : vector<8x32xf32>
    %122 = math.tanh %121 : vector<8x32xf32>
    %123 = arith.mulf %118, %122 : vector<8x32xf32>
    %c48 = arith.constant 48 : index
    %c0_30 = arith.constant 0 : index
    %124 = vector.load %arg7[%c48, %c0_30] : memref<64x128xf32, #tpu.memory_space<vmem>>, vector<8x128xf32>
    %125 = arith.truncf %123 : vector<8x32xf32> to vector<8x32xbf16>
    %cst_31 = arith.constant dense<0.000000e+00> : vector<8x128xf32>
    %126 = tpu.matmul %125, %0, %cst_31 {dimension_numbers = #tpu.dot_dimension_numbers<[1], [0], [0], [1], [0, 0, 1, 1], [], []>} : vector<8x32xbf16>, vector<32x128xbf16>, vector<8x128xf32> -> vector<8x128xf32>
    %127 = arith.addf %124, %126 : vector<8x128xf32>
    %128 = arith.negf %127 : vector<8x128xf32>
    %129 = math.exp %128 : vector<8x128xf32>
    %cst_32 = arith.constant 1.000000e+00 : f32
    %130 = vector.broadcast %cst_32 : f32 to vector<8x128xf32>
    %131 = arith.addf %130, %129 : vector<8x128xf32>
    %132 = arith.divf %130, %131 : vector<8x128xf32>
    %133 = math.tanh %127 : vector<8x128xf32>
    %134 = vector.extract_strided_slice %132 {offsets = [0, 0], sizes = [8, 32], strides = [1, 1]} : vector<8x128xf32> to vector<8x32xf32>
    %135 = vector.extract_strided_slice %132 {offsets = [0, 32], sizes = [8, 32], strides = [1, 1]} : vector<8x128xf32> to vector<8x32xf32>
    %136 = vector.extract_strided_slice %133 {offsets = [0, 64], sizes = [8, 32], strides = [1, 1]} : vector<8x128xf32> to vector<8x32xf32>
    %137 = vector.extract_strided_slice %132 {offsets = [0, 96], sizes = [8, 32], strides = [1, 1]} : vector<8x128xf32> to vector<8x32xf32>
    %138 = arith.mulf %135, %121 : vector<8x32xf32>
    %139 = arith.mulf %134, %136 : vector<8x32xf32>
    %140 = arith.addf %138, %139 : vector<8x32xf32>
    %141 = math.tanh %140 : vector<8x32xf32>
    %142 = arith.mulf %137, %141 : vector<8x32xf32>
    %c56 = arith.constant 56 : index
    %c0_33 = arith.constant 0 : index
    %143 = vector.load %arg7[%c56, %c0_33] : memref<64x128xf32, #tpu.memory_space<vmem>>, vector<8x128xf32>
    %144 = arith.truncf %142 : vector<8x32xf32> to vector<8x32xbf16>
    %cst_34 = arith.constant dense<0.000000e+00> : vector<8x128xf32>
    %145 = tpu.matmul %144, %0, %cst_34 {dimension_numbers = #tpu.dot_dimension_numbers<[1], [0], [0], [1], [0, 0, 1, 1], [], []>} : vector<8x32xbf16>, vector<32x128xbf16>, vector<8x128xf32> -> vector<8x128xf32>
    %146 = arith.addf %143, %145 : vector<8x128xf32>
    %147 = arith.negf %146 : vector<8x128xf32>
    %148 = math.exp %147 : vector<8x128xf32>
    %cst_35 = arith.constant 1.000000e+00 : f32
    %149 = vector.broadcast %cst_35 : f32 to vector<8x128xf32>
    %150 = arith.addf %149, %148 : vector<8x128xf32>
    %151 = arith.divf %149, %150 : vector<8x128xf32>
    %152 = math.tanh %146 : vector<8x128xf32>
    %153 = vector.extract_strided_slice %151 {offsets = [0, 0], sizes = [8, 32], strides = [1, 1]} : vector<8x128xf32> to vector<8x32xf32>
    %154 = vector.extract_strided_slice %151 {offsets = [0, 32], sizes = [8, 32], strides = [1, 1]} : vector<8x128xf32> to vector<8x32xf32>
    %155 = vector.extract_strided_slice %152 {offsets = [0, 64], sizes = [8, 32], strides = [1, 1]} : vector<8x128xf32> to vector<8x32xf32>
    %156 = vector.extract_strided_slice %151 {offsets = [0, 96], sizes = [8, 32], strides = [1, 1]} : vector<8x128xf32> to vector<8x32xf32>
    %157 = arith.mulf %154, %140 : vector<8x32xf32>
    %158 = arith.mulf %153, %155 : vector<8x32xf32>
    %159 = arith.addf %157, %158 : vector<8x32xf32>
    %160 = math.tanh %159 : vector<8x32xf32>
    %161 = arith.mulf %156, %160 : vector<8x32xf32>
    %cst_36 = arith.constant 0.000000e+00 : f32
    %162 = vector.broadcast %cst_36 : f32 to vector<8x32xf32>
    %163 = arith.maximumf %161, %162 : vector<8x32xf32>
    %164 = arith.truncf %163 : vector<8x32xf32> to vector<8x32xbf16>
    %c0_37 = arith.constant 0 : index
    %c0_38 = arith.constant 0 : index
    %165 = vector.load %arg4[%c0_37, %c0_38] : memref<32x128xbf16, #tpu.memory_space<vmem>>, vector<32x128xbf16>
    %cst_39 = arith.constant dense<0.000000e+00> : vector<8x128xf32>
    %166 = tpu.matmul %164, %165, %cst_39 {dimension_numbers = #tpu.dot_dimension_numbers<[1], [0], [0], [1], [0, 0, 1, 1], [], []>} : vector<8x32xbf16>, vector<32x128xbf16>, vector<8x128xf32> -> vector<8x128xf32>
    %c0_40 = arith.constant 0 : index
    %c0_41 = arith.constant 0 : index
    %167 = vector.load %arg5[%c0_40, %c0_41] : memref<1x128xf32, #tpu.memory_space<vmem>>, vector<1x128xf32>
    %168 = vector.broadcast %167 : vector<1x128xf32> to vector<8x128xf32>
    %169 = arith.addf %166, %168 : vector<8x128xf32>
    %c0_42 = arith.constant 0 : index
    %c0_43 = arith.constant 0 : index
    %170 = vector.load %arg6[%c0_42, %c0_43] : memref<8x128xf32, #tpu.memory_space<vmem>>, vector<8x128xf32>
    tpu.vector_store %arg6[%c0_42, %c0_43], %169 {strides = array<i32>} : memref<8x128xf32, #tpu.memory_space<vmem>>, vector<8x128xf32>,
    return
  }
}

</mosaic_0001>

<bundles_post_ra>
// kernel: network_forward.1
= control target key start
LH: loop header
LB: loop body
LE: loop exit
PB: predicated region body
PF: predicated region fallthrough
CT: control target
= control target key end

     0   :  { %v1049_v0 = vmov 0.0   ;;  %vm1050_vm0 = vmmov 0   ;;  %vm71_vm1 = vcmask 130048   ;;  %v1051_v6 = vmov 0   ;;  %s1052_s7 = smov 64   ;;  %s1253_s1 = inlined_call_operand.vmem [shape: bf16[16,128], index: 1, kind: input, shape index: {}]   ;;  %s1254_s2 = inlined_call_operand.vmem [shape: bf16[32,128], index: 2, kind: input, shape index: {}]   ;;  %s1255_s0 = inlined_call_operand.vmem [shape: bf16[64,16], index: 0, kind: input, shape index: {}]   ;;  %s1256_s3 = inlined_call_operand.vmem [shape: f32[1,128], index: 3, kind: input, shape index: {}]   ;;  %s1257_s4 = inlined_call_operand.vmem [shape: bf16[32,128], index: 4, kind: input, shape index: {}]   ;;  %s1258_s5 = inlined_call_operand.vmem [shape: f32[1,128], index: 5, kind: input, shape index: {}]   ;;  %s1259_s6 = inlined_call_operand.vmem [shape: f32[8,128], index: 6, kind: output, shape index: {}]  }
   0x1   :  { %899 = vmatprep.subr.bf16.mxu1 %v1049_v0  ;;  %v976_v1 = vld [vmem:[%s1253_s1] sm:$0xff]   ;;  %903 = vmatprep.mubr.msk.bf16.mxu1 %vm1050_vm0, %v1049_v0  ;;  %v979_v4 = vld [vmem:[%s1255_s0 + $0x8] sm:$0xff]   ;;  %vm170_vm2 = vcmask 261120   ;;  %v981_v49 = vld [vmem:[%s1255_s0 + $0x10] sm:$0xff]  }
   0x2   :  { %v1098_v2 = vld [vmem:[%s1254_s2] sm:$0xff]   ;;  %889 = vmatprep.subr.bf16.mxu0 %v976_v1  ;;  %v1112_v5 = vld [vmem:[%s1254_s2 + $0x8] sm:$0xff]   ;;  %v982_v50 = vld [vmem:[%s1255_s0 + $0x18] sm:$0xff]  }
   0x3   :  { %v978_v3 = vld [vmem:[%s1255_s0] sm:$0xff]   ;;  %900 = vmatpush3.bf16.msra.mxu1 %v1098_v2  ;;  %890 = vmatpush3.bf16.msra.mxu0 %v976_v1 }
   0x4   :  { %891 = vmatprep.mubr.msk.bf16.mxu0 %vm71_vm1, %v978_v3  ;;  %901 = vmatprep.subr.bf16.mxu1 %v1049_v0  ;;  %v1131_v7 = vld [vmem:[%s1256_s3] ss:$0 sm:$0xff]  ;;  %s1053_s3 = smov 32  }
   0x5   :  { %915 = vmatprep.subr.bf16.mxu0 %v1049_v0 }
   0x6   :  { %892 = vmatmul.mubr.msk.bf16.vlgmr.msra.gmra.mrb[0].mxu0 %vm71_vm1, %v979_v4 }
   0x7   :  { %902 = vmatpush3.bf16.msra.mxu1 %v1112_v5  ;;  %916 = vmatpush3.bf16.msra.mxu0 %v1098_v2 }
   0x8   :  { %907 = vmatprep.subr.bf16.mxu1 %v1049_v0  ;;  %917 = vmatprep.subr.bf16.mxu0 %v1049_v0 }
   0x9   :  { %895 = vmatprep.mubr.msk.bf16.mxu0 %vm71_vm1, %v981_v49 }
   0xa   :  { %904 = vmatmul.mubr.bf16.vlgmr.msra.gmra.mrb[0].mxu1 %v1051_v6 }
   0xb   :  { %908 = vmatpush3.bf16.msra.mxu1 %v1098_v2  ;;  %911 = vmatprep.mubr.msk.bf16.mxu1 %vm1050_vm0, %v1049_v0 }
   0xc   :  { %909 = vmatprep.subr.bf16.mxu1 %v1049_v0  ;;  %918 = vmatpush3.bf16.msra.mxu0 %v1112_v5 }
   0xd   :  { %931 = vmatprep.subr.bf16.mxu0 %v1049_v0 }
   0xe   :  { %896 = vmatmul.mubr.msk.bf16.gmra.mrb[4].mxu0 %vm71_vm1, %v982_v50 }
   0xf   :  { %910 = vmatpush3.bf16.msra.mxu1 %v1112_v5  ;;  %919 = vmatprep.mubr.msk.bf16.mxu0 %vm1050_vm0, %v1049_v0 }
  0x10   :  { %923 = vmatprep.subr.bf16.mxu1 %v1049_v0 }
  0xd9   :  { %v1133_v8 = vpop.f32.mrb[0].mxu0 }
  0xda   :  { %v118_v9 = vpop.f32.mrb[1].mxu0  ;;  %v127_v60 = vadd.f32 %v1133_v8, %v1131_v7 }
  0xdb   :  { %v119_v10 = vadd.f32 %v1131_v7, %v118_v9  ;;  %v1136_v11 = vpop.f32.mrb[2].mxu0 }
  0xdc   :  { %v121_v12 = vpop.f32.mrb[3].mxu0 }
  0xdd   :  { %v208_v13 = vpop.f32.mrb[0].mxu1  ;;  %v122_v33 = vadd.f32 %v1131_v7, %v121_v12 }
  0xde   :  { %v214_v14 = vadd.f32 %v208_v13, %v119_v10  ;;  %v905_v15 = vpop.f32.mrb[1].mxu1 }
  0xdf   :  { %v211_v16 = vpop.f32.mrb[2].mxu1 }
  0xe0   :  { %985 = vtanh.f32 %v214_v14  ;;  %v906_v17 = vpop.f32.mrb[3].mxu1  ;;  %v838_v19 = vmul.f32 -1.442695, %v214_v14 }
  0xe1   :  { %v1164_v55 = vpop.f32.mrb[4].mxu0 }
  0xe2   :  { %987 = vpow2.f32 %v838_v19  ;;  %v1166_v56 = vpop.f32.mrb[5].mxu0 }
  0xe3   :  { %v1168_v57 = vpop.f32.mrb[6].mxu0 }
  0xe4   :  { %v1170_v58 = vpop.f32.mrb[7].mxu0 }
  0xea   :  { %v986_v18 = vpop.eup %985 }
  0xeb   :  { %224 = vrot.lane.b32.xlu0 %v986_v18, %s1052_s7 }
  0xec   :  { %v988_v20 = vpop.eup %987 }
  0xed   :  { %v218_v21 = vadd.f32 1.0, %v988_v20 }
  0xef   :  { %989 = vrcp.f32 %v218_v21 }
  0xf9   :  { %v990_v22 = vpop.eup %989 }
  0xfa   :  { %v222_v25 = vmul.f32 0.0, %v990_v22 }
 0x15d   :  { %v225_v23 = vpop.permute.xlu0 %224 }
 0x15e   :  { %v227_v24 = vmul.f32 %v990_v22, %v225_v23 }
 0x160   :  { %229 = vrot.lane.b32.xlu0 %v227_v24, %s1053_s3 }
 0x1d2   :  { %v230_v26 = vpop.permute.xlu0 %229 }
 0x1d3   :  { %v232_v27 = vadd.f32 %v230_v26, %v222_v25 }
 0x1d5   :  { %991 = vtanh.f32 %v232_v27 }
 0x1df   :  { %v992_v28 = vpop.eup %991 }
 0x1e0   :  { %235 = vrot.lane.b32.xlu1 %v992_v28, %s1052_s7 }
 0x252   :  { %v236_v29 = vpop.permute.xlu1 %235 }
 0x253   :  { %v238_v30 = vmul.f32 %v990_v22, %v236_v29  ;;  %v130_v22 = vadd.f32 %v1136_v11, %v1131_v7 }
 0x255   :  { %v240_v31 = vpack.c.bf16 %v238_v30, %v238_v30 }
 0x257   :  { %242 = vrot.lane.b32.xlu1 %v240_v31, %s1053_s3 }
 0x2c9   :  { %v243_v32 = vpop.permute.xlu1 %242 }
 0x2ca   :  { %912 = vmatmul.mubr.msk.bf16.vlgmr.msra.gmra.mrb[4].mxu1 %vm170_vm2, %v243_v32 }
 0x2cb   :  { %924 = vmatpush3.bf16.msra.mxu1 %v1098_v2  ;;  %927 = vmatprep.mubr.msk.bf16.mxu1 %vm1050_vm0, %v1049_v0 }
 0x2cc   :  { %925 = vmatprep.subr.bf16.mxu1 %v1049_v0 }
 0x2cf   :  { %926 = vmatpush3.bf16.msra.mxu1 %v1112_v5 }
 0x2d0   :  { %939 = vmatprep.subr.bf16.mxu1 %v1049_v0 }
 0x39d   :  { %v281_v34 = vpop.f32.mrb[4].mxu1 }
 0x39e   :  { %v287_v35 = vadd.f32 %v281_v34, %v122_v33  ;;  %v913_v36 = vpop.f32.mrb[5].mxu1 }
 0x39f   :  { %v284_v37 = vpop.f32.mrb[6].mxu1 }
 0x3a0   :  { %993 = vtanh.f32 %v287_v35  ;;  %v914_v38 = vpop.f32.mrb[7].mxu1  ;;  %v840_v40 = vmul.f32 -1.442695, %v287_v35 }
 0x3a2   :  { %995 = vpow2.f32 %v840_v40 }
 0x3aa   :  { %v994_v39 = vpop.eup %993 }
 0x3ab   :  { %297 = vrot.lane.b32.xlu0 %v994_v39, %s1052_s7 }
 0x3ac   :  { %v996_v41 = vpop.eup %995 }
 0x3ad   :  { %v291_v42 = vadd.f32 1.0, %v996_v41 }
 0x3af   :  { %997 = vrcp.f32 %v291_v42  ;;  %v135_v42 = vadd.f32 %v1131_v7, %v1166_v56 }
 0x3b9   :  { %v998_v43 = vpop.eup %997 }
 0x3ba   :  { %v295_v46 = vmul.f32 %v998_v43, %v232_v27 }
 0x41d   :  { %v298_v44 = vpop.permute.xlu0 %297 }
 0x41e   :  { %v300_v45 = vmul.f32 %v998_v43, %v298_v44 }
 0x420   :  { %302 = vrot.lane.b32.xlu1 %v300_v45, %s1053_s3 }
 0x492   :  { %v303_v47 = vpop.permute.xlu1 %302 }
 0x493   :  { %v305_v48 = vadd.f32 %v303_v47, %v295_v46 }
 0x495   :  { %999 = vtanh.f32 %v305_v48 }
 0x49f   :  { %v1000_v51 = vpop.eup %999 }
 0x4a0   :  { %308 = vrot.lane.b32.xlu0 %v1000_v51, %s1052_s7 }
 0x512   :  { %v309_v52 = vpop.permute.xlu0 %308 }
 0x513   :  { %v311_v53 = vmul.f32 %v998_v43, %v309_v52 }
 0x515   :  { %v313_v54 = vpack.c.bf16 %v311_v53, %v311_v53 }
 0x517   :  { %315 = vrot.lane.b32.xlu1 %v313_v54, %s1053_s3 }
 0x589   :  { %v316_v59 = vpop.permute.xlu1 %315 }
 0x58a   :  { %920 = vmatmul.mubr.msk.bf16.vlgmr.msra.gmra.mrb[8].mxu0 %vm170_vm2, %v316_v59 }
 0x58b   :  { %932 = vmatpush3.bf16.msra.mxu0 %v1098_v2  ;;  %935 = vmatprep.mubr.msk.bf16.mxu0 %vm1050_vm0, %v1049_v0 }
 0x58c   :  { %933 = vmatprep.subr.bf16.mxu0 %v1049_v0 }
 0x58f   :  { %934 = vmatpush3.bf16.msra.mxu0 %v1112_v5 }
 0x590   :  { %947 = vmatprep.subr.bf16.mxu0 %v1049_v0 }
 0x65d   :  { %v354_v61 = vpop.f32.mrb[8].mxu0 }
 0x65e   :  { %v360_v62 = vadd.f32 %v354_v61, %v127_v60  ;;  %v921_v63 = vpop.f32.mrb[9].mxu0 }
 0x65f   :  { %v357_v1 = vpop.f32.mrb[10].mxu0 }
 0x660   :  { %1001 = vtanh.f32 %v360_v62  ;;  %v922_v3 = vpop.f32.mrb[11].mxu0  ;;  %v842_v6 = vmul.f32 -1.442695, %v360_v62 }
 0x662   :  { %1003 = vpow2.f32 %v842_v6 }
 0x66a   :  { %v1002_v4 = vpop.eup %1001 }
 0x66b   :  { %370 = vrot.lane.b32.xlu0 %v1002_v4, %s1052_s7  ;;  %v138_v4 = vadd.f32 %v1131_v7, %v1170_v58 }
 0x66c   :  { %v1004_v9 = vpop.eup %1003 }
 0x66d   :  { %v364_v10 = vadd.f32 1.0, %v1004_v9 }
 0x66f   :  { %1005 = vrcp.f32 %v364_v10 }
 0x679   :  { %v1006_v12 = vpop.eup %1005 }
 0x67a   :  { %v368_v8 = vmul.f32 %v1006_v12, %v305_v48 }
 0x6dd   :  { %v371_v13 = vpop.permute.xlu0 %370 }
 0x6de   :  { %v373_v14 = vmul.f32 %v1006_v12, %v371_v13 }
 0x6e0   :  { %375 = vrot.lane.b32.xlu1 %v373_v14, %s1053_s3 }
 0x752   :  { %v376_v15 = vpop.permute.xlu1 %375 }
 0x753   :  { %v378_v16 = vadd.f32 %v376_v15, %v368_v8 }
 0x755   :  { %1007 = vtanh.f32 %v378_v16 }
 0x75f   :  { %v1008_v17 = vpop.eup %1007 }
 0x760   :  { %381 = vrot.lane.b32.xlu0 %v1008_v17, %s1052_s7 }
 0x7d2   :  { %v382_v18 = vpop.permute.xlu0 %381 }
 0x7d3   :  { %v384_v19 = vmul.f32 %v1006_v12, %v382_v18 }
 0x7d5   :  { %v386_v20 = vpack.c.bf16 %v384_v19, %v384_v19 }
 0x7d7   :  { %388 = vrot.lane.b32.xlu1 %v386_v20, %s1053_s3 }
 0x849   :  { %v389_v21 = vpop.permute.xlu1 %388 }
 0x84a   :  { %928 = vmatmul.mubr.msk.bf16.vlgmr.msra.gmra.mrb[8].mxu1 %vm170_vm2, %v389_v21 }
 0x84b   :  { %940 = vmatpush3.bf16.msra.mxu1 %v1098_v2  ;;  %943 = vmatprep.mubr.msk.bf16.mxu1 %vm1050_vm0, %v1049_v0 }
 0x84c   :  { %941 = vmatprep.subr.bf16.mxu1 %v1049_v0 }
 0x84f   :  { %942 = vmatpush3.bf16.msra.mxu1 %v1112_v5 }
 0x850   :  { %955 = vmatprep.subr.bf16.mxu1 %v1049_v0 }
 0x91d   :  { %v427_v23 = vpop.f32.mrb[8].mxu1 }
 0x91e   :  { %v433_v24 = vadd.f32 %v427_v23, %v130_v22  ;;  %v929_v25 = vpop.f32.mrb[9].mxu1 }
 0x91f   :  { %v430_v26 = vpop.f32.mrb[10].mxu1  ;;  %v143_v25 = vadd.f32 %v1164_v55, %v1131_v7 }
 0x920   :  { %1009 = vtanh.f32 %v433_v24  ;;  %v930_v27 = vpop.f32.mrb[11].mxu1  ;;  %v844_v29 = vmul.f32 -1.442695, %v433_v24 }
 0x922   :  { %1011 = vpow2.f32 %v844_v29 }
 0x92a   :  { %v1010_v28 = vpop.eup %1009 }
 0x92b   :  { %443 = vrot.lane.b32.xlu0 %v1010_v28, %s1052_s7 }
 0x92c   :  { %v1012_v30 = vpop.eup %1011 }
 0x92d   :  { %v437_v31 = vadd.f32 1.0, %v1012_v30 }
 0x92f   :  { %1013 = vrcp.f32 %v437_v31 }
 0x939   :  { %v1014_v32 = vpop.eup %1013 }
 0x93a   :  { %v441_v11 = vmul.f32 %v1014_v32, %v378_v16 }
 0x99d   :  { %v444_v33 = vpop.permute.xlu0 %443 }
 0x99e   :  { %v446_v34 = vmul.f32 %v1014_v32, %v444_v33 }
 0x9a0   :  { %448 = vrot.lane.b32.xlu1 %v446_v34, %s1053_s3 }
 0xa12   :  { %v449_v35 = vpop.permute.xlu1 %448 }
 0xa13   :  { %v451_v36 = vadd.f32 %v449_v35, %v441_v11 }
 0xa15   :  { %1015 = vtanh.f32 %v451_v36 }
 0xa1f   :  { %v1016_v37 = vpop.eup %1015 }
 0xa20   :  { %454 = vrot.lane.b32.xlu0 %v1016_v37, %s1052_s7 }
 0xa92   :  { %v455_v38 = vpop.permute.xlu0 %454 }
 0xa93   :  { %v457_v39 = vmul.f32 %v1014_v32, %v455_v38 }
 0xa95   :  { %v459_v40 = vpack.c.bf16 %v457_v39, %v457_v39 }
 0xa97   :  { %461 = vrot.lane.b32.xlu1 %v459_v40, %s1053_s3 }
 0xb09   :  { %v462_v41 = vpop.permute.xlu1 %461 }
 0xb0a   :  { %936 = vmatmul.mubr.msk.bf16.vlgmr.msra.gmra.mrb[12].mxu0 %vm170_vm2, %v462_v41 }
 0xb0b   :  { %948 = vmatpush3.bf16.msra.mxu0 %v1098_v2  ;;  %951 = vmatprep.mubr.msk.bf16.mxu0 %vm1050_vm0, %v1049_v0 }
 0xb0c   :  { %949 = vmatprep.subr.bf16.mxu0 %v1049_v0 }
 0xb0f   :  { %950 = vmatpush3.bf16.msra.mxu0 %v1112_v5 }
 0xb10   :  { %963 = vmatprep.subr.bf16.mxu0 %v1049_v0 }
 0xbdd   :  { %v500_v43 = vpop.f32.mrb[12].mxu0 }
 0xbde   :  { %v506_v44 = vadd.f32 %v500_v43, %v135_v42  ;;  %v937_v45 = vpop.f32.mrb[13].mxu0 }
 0xbdf   :  { %v503_v46 = vpop.f32.mrb[14].mxu0 }
 0xbe0   :  { %1017 = vtanh.f32 %v506_v44  ;;  %v938_v47 = vpop.f32.mrb[15].mxu0  ;;  %v846_v49 = vmul.f32 -1.442695, %v506_v44  ;;  %v146_v44 = vadd.f32 %v1168_v57, %v1131_v7 }
 0xbe2   :  { %1019 = vpow2.f32 %v846_v49 }
 0xbea   :  { %v1018_v48 = vpop.eup %1017 }
 0xbeb   :  { %516 = vrot.lane.b32.xlu0 %v1018_v48, %s1052_s7 }
 0xbec   :  { %v1020_v50 = vpop.eup %1019 }
 0xbed   :  { %v510_v51 = vadd.f32 1.0, %v1020_v50 }
 0xbef   :  { %1021 = vrcp.f32 %v510_v51 }
 0xbf9   :  { %v1022_v52 = vpop.eup %1021 }
 0xbfa   :  { %v514_v56 = vmul.f32 %v1022_v52, %v451_v36 }
 0xc5d   :  { %v517_v53 = vpop.permute.xlu0 %516 }
 0xc5e   :  { %v519_v54 = vmul.f32 %v1022_v52, %v517_v53 }
 0xc60   :  { %521 = vrot.lane.b32.xlu1 %v519_v54, %s1053_s3 }
 0xcd2   :  { %v522_v59 = vpop.permute.xlu1 %521 }
 0xcd3   :  { %v524_v60 = vadd.f32 %v522_v59, %v514_v56 }
 0xcd5   :  { %1023 = vtanh.f32 %v524_v60 }
 0xcdf   :  { %v1024_v61 = vpop.eup %1023 }
 0xce0   :  { %527 = vrot.lane.b32.xlu0 %v1024_v61, %s1052_s7  ;;  %v983_v61 = vld [vmem:[%s1257_s4] sm:$0xff]  }
 0xd52   :  { %v528_v62 = vpop.permute.xlu0 %527 }
 0xd53   :  { %v530_v63 = vmul.f32 %v1022_v52, %v528_v62  ;;  %v984_v62 = vld [vmem:[%s1257_s4 + $0x8] sm:$0xff]  }
 0xd55   :  { %v532_v1 = vpack.c.bf16 %v530_v63, %v530_v63 }
 0xd57   :  { %534 = vrot.lane.b32.xlu1 %v532_v1, %s1053_s3 }
 0xdc9   :  { %v535_v3 = vpop.permute.xlu1 %534 }
 0xdca   :  { %944 = vmatmul.mubr.msk.bf16.vlgmr.msra.gmra.mrb[12].mxu1 %vm170_vm2, %v535_v3 }
 0xdcb   :  { %956 = vmatpush3.bf16.msra.mxu1 %v1098_v2  ;;  %959 = vmatprep.mubr.msk.bf16.mxu1 %vm1050_vm0, %v1049_v0 }
 0xdcc   :  { %957 = vmatprep.subr.bf16.mxu1 %v1049_v0 }
 0xdcf   :  { %958 = vmatpush3.bf16.msra.mxu1 %v1112_v5 }
 0xe9d   :  { %v573_v6 = vpop.f32.mrb[12].mxu1 }
 0xe9e   :  { %v579_v9 = vadd.f32 %v573_v6, %v138_v4  ;;  %v945_v10 = vpop.f32.mrb[13].mxu1 }
 0xe9f   :  { %v576_v12 = vpop.f32.mrb[14].mxu1  ;;  %v853_v10 = vld [vmem:[%s1258_s5] ss:$0 sm:$0xff] }
 0xea0   :  { %1025 = vtanh.f32 %v579_v9  ;;  %v946_v13 = vpop.f32.mrb[15].mxu1  ;;  %v848_v2 = vmul.f32 -1.442695, %v579_v9 }
 0xea2   :  { %1027 = vpow2.f32 %v848_v2 }
 0xeaa   :  { %v1026_v14 = vpop.eup %1025 }
 0xeab   :  { %589 = vrot.lane.b32.xlu0 %v1026_v14, %s1052_s7 }
 0xeac   :  { %v1028_v8 = vpop.eup %1027 }
 0xead   :  { %v583_v15 = vadd.f32 1.0, %v1028_v8 }
 0xeaf   :  { %1029 = vrcp.f32 %v583_v15 }
 0xeb9   :  { %v1030_v16 = vpop.eup %1029 }
 0xeba   :  { %v587_v58 = vmul.f32 %v1030_v16, %v524_v60 }
 0xf1d   :  { %v590_v17 = vpop.permute.xlu0 %589 }
 0xf1e   :  { %v592_v5 = vmul.f32 %v1030_v16, %v590_v17 }
 0xf20   :  { %594 = vrot.lane.b32.xlu1 %v592_v5, %s1053_s3 }
 0xf92   :  { %v595_v18 = vpop.permute.xlu1 %594 }
 0xf93   :  { %v597_v19 = vadd.f32 %v595_v18, %v587_v58 }
 0xf95   :  { %1031 = vtanh.f32 %v597_v19 }
 0xf9f   :  { %v1032_v20 = vpop.eup %1031 }
 0xfa0   :  { %600 = vrot.lane.b32.xlu0 %v1032_v20, %s1052_s7 }
0x1012   :  { %v601_v21 = vpop.permute.xlu0 %600 }
0x1013   :  { %v603_v22 = vmul.f32 %v1030_v16, %v601_v21 }
0x1015   :  { %v605_v23 = vpack.c.bf16 %v603_v22, %v603_v22 }
0x1017   :  { %607 = vrot.lane.b32.xlu1 %v605_v23, %s1053_s3 }
0x1089   :  { %v608_v24 = vpop.permute.xlu1 %607 }
0x108a   :  { %952 = vmatmul.mubr.msk.bf16.vlgmr.msra.gmra.mrb[16].mxu0 %vm170_vm2, %v608_v24 }
0x108b   :  { %967 = vmatprep.mubr.msk.bf16.mxu0 %vm1050_vm0, %v1049_v0  ;;  %964 = vmatpush3.bf16.msra.mxu0 %v983_v61 }
0x108c   :  { %965 = vmatprep.subr.bf16.mxu0 %v1049_v0 }
0x108f   :  { %966 = vmatpush3.bf16.msra.mxu0 %v984_v62 }
0x115d   :  { %v646_v26 = vpop.f32.mrb[16].mxu0 }
0x115e   :  { %v652_v27 = vadd.f32 %v646_v26, %v143_v25  ;;  %v953_v28 = vpop.f32.mrb[17].mxu0 }
0x115f   :  { %v649_v29 = vpop.f32.mrb[18].mxu0 }
0x1160   :  { %1033 = vtanh.f32 %v652_v27  ;;  %v954_v30 = vpop.f32.mrb[19].mxu0  ;;  %v850_v32 = vmul.f32 -1.442695, %v652_v27 }
0x1162   :  { %1035 = vpow2.f32 %v850_v32 }
0x116a   :  { %v1034_v31 = vpop.eup %1033 }
0x116b   :  { %662 = vrot.lane.b32.xlu0 %v1034_v31, %s1052_s7 }
0x116c   :  { %v1036_v33 = vpop.eup %1035 }
0x116d   :  { %v656_v34 = vadd.f32 1.0, %v1036_v33 }
0x116f   :  { %1037 = vrcp.f32 %v656_v34 }
0x1179   :  { %v1038_v11 = vpop.eup %1037 }
0x117a   :  { %v660_v55 = vmul.f32 %v1038_v11, %v597_v19 }
0x11dd   :  { %v663_v35 = vpop.permute.xlu0 %662 }
0x11de   :  { %v665_v36 = vmul.f32 %v1038_v11, %v663_v35 }
0x11e0   :  { %667 = vrot.lane.b32.xlu1 %v665_v36, %s1053_s3 }
0x1252   :  { %v668_v37 = vpop.permute.xlu1 %667 }
0x1253   :  { %v670_v38 = vadd.f32 %v668_v37, %v660_v55 }
0x1255   :  { %1039 = vtanh.f32 %v670_v38 }
0x125f   :  { %v1040_v39 = vpop.eup %1039 }
0x1260   :  { %673 = vrot.lane.b32.xlu0 %v1040_v39, %s1052_s7 }
0x12d2   :  { %v674_v40 = vpop.permute.xlu0 %673 }
0x12d3   :  { %v676_v41 = vmul.f32 %v1038_v11, %v674_v40 }
0x12d5   :  { %v678_v42 = vpack.c.bf16 %v676_v41, %v676_v41 }
0x12d7   :  { %680 = vrot.lane.b32.xlu1 %v678_v42, %s1053_s3 }
0x1349   :  { %v681_v43 = vpop.permute.xlu1 %680 }
0x134a   :  { %960 = vmatmul.mubr.msk.bf16.vlgmr.msra.gmra.mrb[16].mxu1 %vm170_vm2, %v681_v43 }
0x141d   :  { %v719_v45 = vpop.f32.mrb[16].mxu1 }
0x141e   :  { %v725_v46 = vadd.f32 %v719_v45, %v146_v44  ;;  %v961_v47 = vpop.f32.mrb[17].mxu1 }
0x141f   :  { %v722_v48 = vpop.f32.mrb[18].mxu1 }
0x1420   :  { %1041 = vtanh.f32 %v725_v46  ;;  %v962_v49 = vpop.f32.mrb[19].mxu1  ;;  %v852_v51 = vmul.f32 -1.442695, %v725_v46 }
0x1422   :  { %1043 = vpow2.f32 %v852_v51 }
0x142a   :  { %v1042_v50 = vpop.eup %1041 }
0x142b   :  { %735 = vrot.lane.b32.xlu0 %v1042_v50, %s1052_s7 }
0x142c   :  { %v1044_v52 = vpop.eup %1043 }
0x142d   :  { %v729_v53 = vadd.f32 1.0, %v1044_v52 }
0x142f   :  { %1045 = vrcp.f32 %v729_v53 }
0x1439   :  { %v1046_v54 = vpop.eup %1045 }
0x143a   :  { %v733_v7 = vmul.f32 %v1046_v54, %v670_v38 }
0x149d   :  { %v736_v56 = vpop.permute.xlu0 %735 }
0x149e   :  { %v738_v59 = vmul.f32 %v1046_v54, %v736_v56 }
0x14a0   :  { %740 = vrot.lane.b32.xlu1 %v738_v59, %s1053_s3 }
0x1512   :  { %v741_v57 = vpop.permute.xlu1 %740 }
0x1513   :  { %v743_v60 = vadd.f32 %v741_v57, %v733_v7 }
0x1515   :  { %1047 = vtanh.f32 %v743_v60 }
0x151f   :  { %v1048_v63 = vpop.eup %1047 }
0x1520   :  { %746 = vrot.lane.b32.xlu0 %v1048_v63, %s1052_s7 }
0x1592   :  { %v747_v1 = vpop.permute.xlu0 %746 }
0x1593   :  { %v749_v3 = vmul.f32 %v1046_v54, %v747_v1 }
0x1595   :  { %v750_v4 = vmax.f32 %v749_v3, 0.0 }
0x1597   :  { %v751_v6 = vpack.c.bf16 %v750_v4, %v750_v4 }
0x1599   :  { %764 = vrot.lane.b32.xlu1 %v751_v6, %s1053_s3 }
0x160b   :  { %v765_v9 = vpop.permute.xlu1 %764 }
0x160c   :  { %968 = vmatmul.mubr.msk.bf16.vlgmr.msra.gmra.mrb[20].mxu0 %vm170_vm2, %v765_v9 }
0x16df   :  { %v815_v12 = vpop.f32.mrb[20].mxu0 }
0x16e0   :  { %v816_v13 = vadd.f32 %v853_v10, %v815_v12  ;;  %v969_v0 = vpop.f32.mrb[21].mxu0 }
0x16e1   :  { %v818_v14 = vpop.f32.mrb[22].mxu0 }
0x16e2   :  { %821 = vst [vmem:[%s1259_s6] sm:$0xff] %v816_v13  ;;  %v970_v2 = vpop.f32.mrb[23].mxu0 }

</bundles_post_ra>
